<compile_context>
chip_gen: v7x
topology: tpu7x:2x2x1
jax: 0.10.0
libtpu: 0.0.40
codegen_flags: <defaults>
</compile_context>

<pallas_src>
import numpy as np
import jax
import jax.numpy as jnp
from jax.experimental import pallas as pl
from jax.experimental.pallas import tpu as pltpu


# ----------------------------------------------------------------------------
# Host-side glue: class-count schedule + "AA" per-class weights (mirrors the
# PyTorch get_num_class_list / get_weight_list / update_weight math).
# ----------------------------------------------------------------------------
def get_num_class_list(split):
    the_split = split['split']
    num_classes = split['num_classes']
    cls_num = num_classes
    if the_split == 'xset_train':
        skeleton_max = 400
        imb_factor = 0.01
    elif the_split == 'train':
        skeleton_max = 100
        imb_factor = 0.1
    else:
        skeleton_max = 600
        imb_factor = 0.01
    skeleton_num_per_cls = []
    for cls_idx in range(cls_num):
        num = skeleton_max * imb_factor ** (cls_idx / (cls_num - 1.0))
        skeleton_num_per_cls.append(int(num))
    return skeleton_num_per_cls


def get_weight_list(num_class_list):
    num_max = max(num_class_list)
    num_min = min(num_class_list)
    upsilon = 0.99
    lamda = 0.0099
    weight = []
    for idx in range(len(num_class_list)):
        the_weight = (num_class_list[idx] - num_min) / (num_max - num_min) * lamda + upsilon
        weight.append(the_weight)
    return weight


def compute_aa_weight(beta, num_class_list):
    """Mirrors TwostageAALoss.update_weight for a single call.

    `beta` is either the per-class weight_class_list (stage 2) or [0] (stage 1).
    """
    beta = np.asarray(beta, dtype=np.float64)
    counts = np.asarray(num_class_list, dtype=np.float64)
    effective_num = 1.0 - np.power(beta, counts)          # broadcasts for beta=[0]
    beta = 1.0 - beta
    per_cls_weights = beta / effective_num
    per_cls_weights = per_cls_weights / np.sum(per_cls_weights) * len(num_class_list)
    return per_cls_weights.astype(np.float32)


def _cdiv(a, b):
    return (a + b - 1) // b


def _round_up(a, b):
    return _cdiv(a, b) * b


def _tpu_vmem_and_cores():
    """Per-TensorCore VMEM bytes and TC count, with safe fallbacks."""
    vmem_bytes = 64 * 1024 * 1024          # conservative default (v7x per-TC)
    try:
        info = pltpu.get_tpu_info()
        for attr in ("vmem_capacity_bytes", "vmem_bytes", "vmem_size_bytes"):
            v = getattr(info, attr, None)
            if v:
                vmem_bytes = int(v)
                break
    except Exception:
        pass
    num_cores = 1                          # v5e / v6e: 1 TC per chip
    try:
        kind = jax.devices()[0].device_kind.lower()
        if "v7" in kind:                   # v7x: 2 TCs per chip
            num_cores = 2
    except Exception:
        pass
    return vmem_bytes, num_cores


# ----------------------------------------------------------------------------
# Pallas kernel: weighted cross-entropy numerator partial sums.
#   per core: num = sum_i w[t_i] * (lse_i - x_{i, t_i})
# Denominator sum_i w[t_i] and the final divide happen in JAX (O(N) work).
# ----------------------------------------------------------------------------
def _weighted_ce_kernel(x_ref, t_ref, wt_ref, num_ref):
    i = pl.program_id(1)

    @pl.when(i == 0)
    def _():
        num_ref[...] = jnp.zeros_like(num_ref)

    x = x_ref[...].astype(jnp.float32)            # (tile_n, C) logits
    t = t_ref[...]                                # (tile_n, 1) int32 targets (-1 => pad/OOB row)
    wt = wt_ref[...]                              # (tile_n, 1) f32 per-row weights (0 on pad rows)
    n, c = x.shape

    # numerically stable logsumexp over the class dim (lane reduces)
    m = jnp.max(x, axis=-1, keepdims=True)                              # (n, 1)
    s = jnp.sum(jnp.exp(x - m), axis=-1, keepdims=True)                 # (n, 1)
    lse = m + jnp.log(s)                                                # (n, 1)

    # one-hot gather of the target logit: one wide select + one lane reduce
    col = jax.lax.broadcasted_iota(jnp.int32, (n, c), 1)
    x_t = jnp.sum(jnp.where(col == t, x, 0.0), axis=-1, keepdims=True)  # (n, 1)

    # per-row weighted NLL; explicit row-valid mask kills garbage/NaN rows
    # coming from batch padding or partially/fully out-of-bounds tile reads.
    contrib = jnp.where(t >= 0, wt * (lse - x_t), 0.0)                  # (n, 1)

    # accumulate directly into the VMEM-resident per-core output block
    num_ref[...] = num_ref[...] + jnp.sum(contrib)


def weighted_cross_entropy_pallas(logits, targets, weight, *, num_cores=None):
    """logits: (N, C) f32/bf16, targets: (N,) int, weight: (C,) f32 -> scalar.

    Matches F.cross_entropy(input, target, weight=w, reduction='mean'):
        sum_i w[t_i] * nll_i / sum_i w[t_i]
    (returns NaN if the weight sum is 0, like PyTorch).
    """
    n, c = logits.shape
    itemsize = jnp.dtype(logits.dtype).itemsize

    vmem_bytes, auto_cores = _tpu_vmem_and_cores()
    if num_cores is None:
        num_cores = auto_cores
    vmem_limit = int(min(vmem_bytes * 3 // 4, 96 * 1024 * 1024))

    # --- batch-tile sizing against real VMEM footprint ---
    # per batch-row bytes: 2 double-buffered logits blocks + ~4 f32 (tile_n, C)
    # temporaries around the reduction boundaries + two narrow (tile_n, 1)
    # inputs that lay out as (tile_n, 128) x 2 buffers each.
    c_lanes = _round_up(c, 128)
    per_row = 2 * c_lanes * itemsize + 4 * c_lanes * 4 + 2 * 2 * 128 * 4
    budget = (vmem_limit * 3) // 4
    tile_n = budget // per_row
    tile_n = max(16, min(4096, (tile_n // 16) * 16))
    tile_n = min(tile_n, _round_up(_cdiv(n, num_cores), 16))
    # TODO(synk): for very large C (>= ~8-16K classes, especially on v7x's
    # 64 MiB VMEM) add a class-dim grid axis with an online (flash-style)
    # logsumexp instead of one full-C block.

    n_blocks = _cdiv(n, tile_n)
    tiles_per_core = _cdiv(n_blocks, num_cores)
    n_pad = num_cores * tiles_per_core * tile_n
    last_blk = n_blocks - 1

    # per-row weights + denominator in the wrapper (targets are in-range here,
    # so no negative-index wrap issue; padding rows get wt = 0, t = -1 below)
    w = weight.astype(jnp.float32)
    w_t = w[targets]                                   # (N,)
    den = jnp.sum(w_t)

    t = targets.astype(jnp.int32).reshape(n, 1)
    wt = w_t.reshape(n, 1)
    if n_pad != n:                                     # tiny O(N) pads only
        t = jnp.pad(t, ((0, n_pad - n), (0, 0)), constant_values=-1)
        wt = jnp.pad(wt, ((0, n_pad - n), (0, 0)))

    out_num = pl.pallas_call(
        _weighted_ce_kernel,
        out_shape=jax.ShapeDtypeStruct((num_cores, 128), jnp.float32),
        grid_spec=pltpu.PrefetchScalarGridSpec(
            num_scalar_prefetch=0,
            grid=(num_cores, tiles_per_core),
            in_specs=[
                # Logits stay unpadded in HBM (block last dim == full C).
                # Clamp fully-out-of-bounds trailing block indices back onto
                # the last real block; those rows are masked via t == -1.
                pl.BlockSpec(
                    (tile_n, c),
                    lambda cc, i: (jnp.minimum(cc * tiles_per_core + i, last_blk), 0)),
                pl.BlockSpec((tile_n, 1), lambda cc, i: (cc * tiles_per_core + i, 0)),
                pl.BlockSpec((tile_n, 1), lambda cc, i: (cc * tiles_per_core + i, 0)),
            ],
            out_specs=pl.BlockSpec((1, 128), lambda cc, i: (cc, 0)),
        ),
        compiler_params=pltpu.CompilerParams(
            dimension_semantics=("parallel", "arbitrary"),
            vmem_limit_bytes=vmem_limit,
        ),
    )(logits, t, wt)

    num = jnp.sum(out_num[:, 0])     # each lane of a core's row holds the same partial
    return num / den                 # NaN if den == 0 — same as PyTorch weighted-mean CE


# ----------------------------------------------------------------------------
# Module-equivalent wrapper (keeps the stateful schedule of TwostageAALoss)
# ----------------------------------------------------------------------------
class TwostageAALossPallas:
    def __init__(self, weight=None):
        scheduler = 'drw'
        self.change = 0
        self.epoch = -1
        self.step_epoch = 20
        if scheduler == 'drw':
            self.betas = [0, 1]
        elif scheduler == 'default':
            self.betas = [1, 1]
        self.weight = weight
        self.num_class_list = None
        self.weight_class_list = None

    def reset_epoch(self, epoch):
        idx = (epoch + 1) // self.step_epoch
        beta = self.betas[idx]
        if beta > 0:
            w = compute_aa_weight(self.weight_class_list, self.num_class_list)
        else:
            w = compute_aa_weight([0], self.num_class_list)
        self.weight = jnp.asarray(w, dtype=jnp.float32)

    def __call__(self, input, target, epoch, split):
        the_epoch = epoch['epoch']
        if self.change == 0:
            self.num_class_list = get_num_class_list(split)
            self.weight_class_list = get_weight_list(self.num_class_list)
            self.change = 1
        if self.epoch != the_epoch:
            self.reset_epoch(the_epoch)
            self.epoch = the_epoch
        return weighted_cross_entropy_pallas(input, target, self.weight)


# ----------------------------------------------------------------------------
# Pure-JAX reference for sanity checking
# ----------------------------------------------------------------------------
def _reference_weighted_ce(logits, targets, weight):
    logp = jax.nn.log_softmax(logits.astype(jnp.float32), axis=-1)
    nll = -jnp.take_along_axis(logp, targets[:, None], axis=-1)[:, 0]
    w_t = weight[targets]
    return jnp.sum(w_t * nll) / jnp.sum(w_t)


if __name__ == "__main__":
    key = jax.random.PRNGKey(0)
    # odd batch + non-128 class count exercises the partial-block / row-mask path
    N, C = 37, 60

    k_x, k_t = jax.random.split(key)
    logits = jax.random.normal(k_x, (N, C), dtype=jnp.float32)
    targets = jax.random.randint(k_t, (N,), 0, C, dtype=jnp.int32)

    split = {'split': 'train', 'num_classes': C}
    epoch = {'epoch': 25}  # (25 + 1) // 20 = 1 -> beta = 1 -> non-trivial AA weights

    loss_mod = TwostageAALossPallas()
    loss = loss_mod(logits, targets, epoch, split)
    loss = jax.block_until_ready(loss)

    ref = _reference_weighted_ce(logits, targets, loss_mod.weight)
    assert np.allclose(np.asarray(loss), np.asarray(ref), rtol=1e-5, atol=1e-5), (loss, ref)

    print("KERNEL_OK")
</pallas_src>

<mosaic_0001>
module attributes {stable_mosaic.version = 11 : i64} {
  func.func @_weighted_ce_kernel(%arg0: i32, %arg1: i32, %arg2: memref<48x60xf32, #tpu.memory_space<vmem>>, %arg3: memref<48x1xi32, #tpu.memory_space<vmem>>, %arg4: memref<48x1xf32, #tpu.memory_space<vmem>>, %arg5: memref<1x128xf32, #tpu.memory_space<vmem>>) attributes {dimension_semantics = [#tpu.dimension_semantics<parallel>, #tpu.dimension_semantics<arbitrary>], iteration_bounds = array<i64: 1, 1>, scalar_prefetch = 0 : i64, scratch_operands = 0 : i64, tpu.core_type = #tpu.core_type<tc>, window_params = [{transform_indices = @transform_0, window_bounds = array<i64: 48, 60>}, {transform_indices = @transform_1, window_bounds = array<i64: 48, 1>}, {transform_indices = @transform_2, window_bounds = array<i64: 48, 1>}, {transform_indices = @transform_3, window_bounds = array<i64: 1, 128>}]} {
    %c0_i32 = arith.constant 0 : i32
    %0 = arith.cmpi eq, %arg1, %c0_i32 : i32
    %1 = arith.extui %0 : i1 to i32
    %c0_i32_0 = arith.constant 0 : i32
    %2 = arith.cmpi ne, %1, %c0_i32_0 : i32
    scf.if %2 {
      %cst_16 = arith.constant 0.000000e+00 : f32
      %36 = vector.broadcast %cst_16 : f32 to vector<1x128xf32>
      %c0_17 = arith.constant 0 : index
      %c0_18 = arith.constant 0 : index
      %37 = vector.load %arg5[%c0_17, %c0_18] : memref<1x128xf32, #tpu.memory_space<vmem>>, vector<1x128xf32>
      tpu.vector_store %arg5[%c0_17, %c0_18], %36 {strides = array<i32>} : memref<1x128xf32, #tpu.memory_space<vmem>>, vector<1x128xf32>,
    } else {
    }
    %c0 = arith.constant 0 : index
    %c0_1 = arith.constant 0 : index
    %3 = vector.load %arg2[%c0, %c0_1] : memref<48x60xf32, #tpu.memory_space<vmem>>, vector<48x60xf32>
    %c0_2 = arith.constant 0 : index
    %c0_3 = arith.constant 0 : index
    %4 = vector.load %arg3[%c0_2, %c0_3] : memref<48x1xi32, #tpu.memory_space<vmem>>, vector<48x1xi32>
    %c0_4 = arith.constant 0 : index
    %c0_5 = arith.constant 0 : index
    %5 = vector.load %arg4[%c0_4, %c0_5] : memref<48x1xf32, #tpu.memory_space<vmem>>, vector<48x1xf32>
    %cst = arith.constant dense<0xFF800000> : vector<48xf32>
    %6 = vector.multi_reduction <maximumf>, %3, %cst [1] : vector<48x60xf32> to vector<48xf32>
    %7 = vector.shape_cast %6 : vector<48xf32> to vector<48x1xf32>
    %8 = vector.broadcast %7 : vector<48x1xf32> to vector<48x60xf32>
    %9 = arith.subf %3, %8 : vector<48x60xf32>
    %10 = math.exp %9 : vector<48x60xf32>
    %cst_6 = arith.constant dense<0.000000e+00> : vector<48xf32>
    %11 = vector.multi_reduction <add>, %10, %cst_6 [1] : vector<48x60xf32> to vector<48xf32>
    %12 = vector.shape_cast %11 : vector<48xf32> to vector<48x1xf32>
    %13 = math.log %12 : vector<48x1xf32>
    %14 = arith.addf %7, %13 : vector<48x1xf32>
    %15 = tpu.iota {dimensions = array<i32: 1>} : vector<48x60xi32>
    %16 = vector.broadcast %4 : vector<48x1xi32> to vector<48x60xi32>
    %17 = arith.cmpi eq, %15, %16 : vector<48x60xi32>
    %cst_7 = arith.constant 0.000000e+00 : f32
    %18 = vector.broadcast %cst_7 : f32 to vector<48x60xf32>
    %19 = arith.select %17, %3, %18 : vector<48x60xi1>, vector<48x60xf32>
    %cst_8 = arith.constant dense<0.000000e+00> : vector<48xf32>
    %20 = vector.multi_reduction <add>, %19, %cst_8 [1] : vector<48x60xf32> to vector<48xf32>
    %21 = vector.shape_cast %20 : vector<48xf32> to vector<48x1xf32>
    %c0_i32_9 = arith.constant 0 : i32
    %22 = vector.broadcast %c0_i32_9 : i32 to vector<48x1xi32>
    %23 = arith.cmpi sge, %4, %22 : vector<48x1xi32>
    %24 = arith.subf %14, %21 : vector<48x1xf32>
    %25 = arith.mulf %5, %24 : vector<48x1xf32>
    %cst_10 = arith.constant 0.000000e+00 : f32
    %26 = vector.broadcast %cst_10 : f32 to vector<48x1xf32>
    %27 = arith.select %23, %25, %26 : vector<48x1xi1>, vector<48x1xf32>
    %c0_11 = arith.constant 0 : index
    %c0_12 = arith.constant 0 : index
    %28 = vector.load %arg5[%c0_11, %c0_12] : memref<1x128xf32, #tpu.memory_space<vmem>>, vector<1x128xf32>
    %29 = vector.shape_cast %27 : vector<48x1xf32> to vector<1x48x1xf32>
    %cst_13 = arith.constant dense<0.000000e+00> : vector<1xf32>
    %30 = vector.multi_reduction <add>, %29, %cst_13 [1, 2] : vector<1x48x1xf32> to vector<1xf32>
    %31 = vector.shape_cast %30 : vector<1xf32> to vector<1x1x1xf32>
    %32 = vector.extract %31[0, 0, 0] : f32 from vector<1x1x1xf32>
    %33 = vector.broadcast %32 : f32 to vector<1x128xf32>
    %34 = arith.addf %28, %33 : vector<1x128xf32>
    %c0_14 = arith.constant 0 : index
    %c0_15 = arith.constant 0 : index
    %35 = vector.load %arg5[%c0_14, %c0_15] : memref<1x128xf32, #tpu.memory_space<vmem>>, vector<1x128xf32>
    tpu.vector_store %arg5[%c0_14, %c0_15], %34 {strides = array<i32>} : memref<1x128xf32, #tpu.memory_space<vmem>>, vector<1x128xf32>,
    return
  }
  func.func @transform_0(%arg0: i32, %arg1: i32) -> (i32, i32) {
    %c1_i32 = arith.constant 1 : i32
    %0 = arith.muli %arg0, %c1_i32 : i32
    %1 = arith.addi %0, %arg1 : i32
    %c0_i32 = arith.constant 0 : i32
    %2 = arith.minsi %1, %c0_i32 : i32
    %c0_i32_0 = arith.constant 0 : i32
    %c0_i32_1 = arith.constant 0 : i32
    return %2, %c0_i32_0 : i32, i32
  }
  func.func @transform_1(%arg0: i32, %arg1: i32) -> (i32, i32) {
    %c1_i32 = arith.constant 1 : i32
    %0 = arith.muli %arg0, %c1_i32 : i32
    %1 = arith.addi %0, %arg1 : i32
    %c0_i32 = arith.constant 0 : i32
    %c0_i32_0 = arith.constant 0 : i32
    return %1, %c0_i32 : i32, i32
  }
  func.func @transform_2(%arg0: i32, %arg1: i32) -> (i32, i32) {
    %c1_i32 = arith.constant 1 : i32
    %0 = arith.muli %arg0, %c1_i32 : i32
    %1 = arith.addi %0, %arg1 : i32
    %c0_i32 = arith.constant 0 : i32
    %c0_i32_0 = arith.constant 0 : i32
    return %1, %c0_i32 : i32, i32
  }
  func.func @transform_3(%arg0: i32, %arg1: i32) -> (i32, i32) {
    %c0_i32 = arith.constant 0 : i32
    %c0_i32_0 = arith.constant 0 : i32
    return %arg0, %c0_i32 : i32, i32
  }
}

</mosaic_0001>

<bundles_post_ra>
// kernel: tpu_custom_call.1
= control target key start
LH: loop header
LB: loop body
LE: loop exit
PB: predicated region body
PF: predicated region fallthrough
CT: control target
= control target key end

     0   :  { %vm124_vm0 = vcmask 490496   ;;  %v383_v6 = vmov 0   ;;  %s582_s0 = inlined_call_operand.vmem [shape: f32[37,60], index: 0, kind: input, shape index: {}]   ;;  %s583_s1 = inlined_call_operand.vmem [shape: s32[48,1], index: 1, kind: input, shape index: {}]   ;;  %s584_s2 = inlined_call_operand.vmem [shape: f32[48,1], index: 2, kind: input, shape index: {}]   ;;  %s585_s3 = inlined_call_operand.hbm [shape: f32[1,128], index: 3, kind: output, shape index: {}]  }
   0x1   :  { %v409_v0 = vld [vmem:[%s582_s0 + $0x10] sm:$0xff]  ;;  %v414_v1 = vld [vmem:[%s582_s0] sm:$0xff]  ;;  %v419_v2 = vld [vmem:[%s582_s0 + $0x18] sm:$0xff]  ;;  %334 = vset.pattern.permute.xlu1 %v383_v6  ;;  %333 = vset.pattern.permute.xlu0 %v383_v6 }
   0x2   :  { %v131_v3 = vsel %vm124_vm0, %v409_v0, -inf  ;;  %v125_v4 = vsel %vm124_vm0, %v414_v1, -inf  ;;  %v428_v5 = vld [vmem:[%s582_s0 + $0x8] sm:$0xff]  ;;  %v134_v7 = vsel %vm124_vm0, %v419_v2, -inf  ;;  %v442_v10 = vld [vmem:[%s582_s0 + $0x20] sm:$0xff] }
   0x3   :  { %132 = vmax.xlane.f32.xlu1 %v131_v3  ;;  %126 = vmax.xlane.f32.xlu0 %v125_v4  ;;  %v128_v8 = vsel %vm124_vm0, %v428_v5, -inf  ;;  %v437_v9 = vld [vmem:[%s582_s0 + $0x28] sm:$0xff] }
   0x4   :  { %8 = vsyncpa [#allocation3], 0  ;;  %v140_v11 = vsel %vm124_vm0, %v437_v9, -inf  ;;  %v137_v12 = vsel %vm124_vm0, %v442_v10, -inf  ;;  %v451_v13 = vld [vmem:[%s583_s1 + $0x8] sm:$0xff]  ;;  %v457_v14 = vld [vmem:[%s583_s1 + $0x10] sm:$0xff]  ;;  %v197_v38 = vlaneseq }
   0x5   :  { %v462_v15 = vld [vmem:[%s583_s1] sm:$0xff]  ;;  %v468_v16 = vld [vmem:[%s583_s1 + $0x18] sm:$0xff]  ;;  %v481_v18 = vld [vmem:[%s583_s1 + $0x28] sm:$0xff]  ;;  %vm248_vm8 = vcmp.ge.s32.totalorder %v451_v13, 0  ;;  %vm249_vm9 = vcmp.ge.s32.totalorder %v457_v14, 0  ;;  %vm272_vm10 = vcmask 7168  }
   0x6   :  { %v475_v17 = vld [vmem:[%s583_s1 + $0x20] sm:$0xff]  ;;  %v198_v42 = vand.u32 127, %v197_v38  ;;  %vm247_vm7 = vcmp.ge.s32.totalorder %v462_v15, 0  ;;  %vm250_vm11 = vcmp.ge.s32.totalorder %v468_v16, 0  ;;  %vm252_vm13 = vcmp.ge.s32.totalorder %v481_v18, 0 }
   0x7   :  { %135 = vmax.xlane.f32.xlu1 %v134_v7  ;;  %129 = vmax.xlane.f32.xlu0 %v128_v8  ;;  %vm251_vm12 = vcmp.ge.s32.totalorder %v475_v17, 0 }
   0xb   :  { %141 = vmax.xlane.f32.xlu1 %v140_v11  ;;  %138 = vmax.xlane.f32.xlu0 %v137_v12 }
  0x1c   :  { %203 = vperm.xlu1 %334, %v451_v13  }
  0x20   :  { %206 = vperm.xlu1 %334, %v457_v14  }
  0x21   :  { %200 = vperm.xlu0 %333, %v462_v15  }
  0x24   :  { %209 = vperm.xlu1 %334, %v468_v16   ;;  %v384_v16 = vmov 0.0  }
  0x25   :  { %105 = vst [vmem:[#allocation2] sm:$0x1] %v384_v16 }
  0x28   :  { %212 = vperm.xlu1 %334, %v475_v17  }
  0x2c   :  { %215 = vperm.xlu1 %334, %v481_v18  }
  0x90   :  { %v484_v19 = vpop.xlane.xlu1 %132  ;;  %v486_v20 = vpop.xlane.xlu0 %126 }
  0x91   :  { %v145_v21 = vsub.f32 %v409_v0, %v484_v19  ;;  %v143_v22 = vsub.f32 %v414_v1, %v486_v20 }
  0x93   :  { %v153_v23 = vmul.f32 1.442695, %v145_v21  ;;  %v149_v24 = vmul.f32 1.442695, %v143_v22 }
  0x94   :  { %v492_v25 = vpop.xlane.xlu1 %135  ;;  %v494_v26 = vpop.xlane.xlu0 %129 }
  0x95   :  { %335 = vpow2.f32 %v153_v23  ;;  %v146_v27 = vsub.f32 %v419_v2, %v492_v25  ;;  %v144_v28 = vsub.f32 %v428_v5, %v494_v26 }
  0x96   :  { %337 = vpow2.f32 %v149_v24 }
  0x97   :  { %v155_v29 = vmul.f32 1.442695, %v146_v27  ;;  %v151_v30 = vmul.f32 1.442695, %v144_v28  ;;  %v118_v28 = vld [vmem:[%s584_s2] sm:$0xff] }
  0x98   :  { %v500_v31 = vpop.xlane.xlu1 %141  ;;  %v502_v32 = vpop.xlane.xlu0 %138 }
  0x99   :  { %339 = vpow2.f32 %v155_v29  ;;  %v148_v33 = vsub.f32 %v437_v9, %v500_v31  ;;  %v147_v34 = vsub.f32 %v442_v10, %v502_v32 }
  0x9a   :  { %341 = vpow2.f32 %v151_v30 }
  0x9b   :  { %v159_v35 = vmul.f32 1.442695, %v148_v33  ;;  %v157_v36 = vmul.f32 1.442695, %v147_v34 }
  0x9c   :  { %v204_v37 = vpop.permute.xlu1 %203 }
  0x9d   :  { %343 = vpow2.f32 %v159_v35  ;;  %vm218_vm2 = vcmp.eq.s32.totalorder %v198_v42, %v204_v37 }
  0x9e   :  { %345 = vpow2.f32 %v157_v36  ;;  %v224_v58 = vsel %vm218_vm2, %v428_v5, 0.0 }
  0x9f   :  { %v336_v39 = vpop.eup %335  ;;  %v232_v61 = vsel %vm124_vm0, %v224_v58, 0.0 }
  0xa0   :  { %v338_v40 = vpop.eup %337  ;;  %v207_v41 = vpop.permute.xlu1 %206  ;;  %v167_v46 = vsel %vm124_vm0, %v336_v39, 0.0 }
  0xa1   :  { %v161_v43 = vsel %vm124_vm0, %v338_v40, 0.0  ;;  %v201_v44 = vpop.permute.xlu0 %200  ;;  %vm219_vm3 = vcmp.eq.s32.totalorder %v198_v42, %v207_v41  ;;  %v119_v41 = vld [vmem:[%s584_s2 + $0x8] sm:$0xff] }
  0xa2   :  { %162 = vadd.xlane.f32.xlu1 %v161_v43  ;;  %vm217_vm1 = vcmp.eq.s32.totalorder %v198_v42, %v201_v44  ;;  %v225_v59 = vsel %vm219_vm3, %v409_v0, 0.0 }
  0xa3   :  { %v340_v45 = vpop.eup %339  ;;  %v223_v53 = vsel %vm217_vm1, %v414_v1, 0.0  ;;  %v235_v62 = vsel %vm124_vm0, %v225_v59, 0.0 }
  0xa4   :  { %v342_v47 = vpop.eup %341  ;;  %v210_v48 = vpop.permute.xlu1 %209  ;;  %v170_v51 = vsel %vm124_vm0, %v340_v45, 0.0  ;;  %v229_v57 = vsel %vm124_vm0, %v223_v53, 0.0 }
  0xa5   :  { %v164_v49 = vsel %vm124_vm0, %v342_v47, 0.0  ;;  %vm220_vm4 = vcmp.eq.s32.totalorder %v198_v42, %v210_v48  ;;  %v121_v48 = vld [vmem:[%s584_s2 + $0x18] sm:$0xff] }
  0xa6   :  { %168 = vadd.xlane.f32.xlu1 %v167_v46  ;;  %165 = vadd.xlane.f32.xlu0 %v164_v49  ;;  %v226_v63 = vsel %vm220_vm4, %v419_v2, 0.0 }
  0xa7   :  { %v344_v50 = vpop.eup %343  ;;  %v238_v3 = vsel %vm124_vm0, %v226_v63, 0.0 }
  0xa8   :  { %v346_v52 = vpop.eup %345  ;;  %v213_v55 = vpop.permute.xlu1 %212  ;;  %v176_v56 = vsel %vm124_vm0, %v344_v50, 0.0 }
  0xa9   :  { %v173_v54 = vsel %vm124_vm0, %v346_v52, 0.0  ;;  %vm221_vm5 = vcmp.eq.s32.totalorder %v198_v42, %v213_v55  ;;  %v122_v52 = vld [vmem:[%s584_s2 + $0x20] sm:$0xff] }
  0xaa   :  { %171 = vadd.xlane.f32.xlu1 %v170_v51  ;;  %174 = vadd.xlane.f32.xlu0 %v173_v54  ;;  %v227_v1 = vsel %vm221_vm5, %v442_v10, 0.0 }
  0xab   :  { %v241_v4 = vsel %vm124_vm0, %v227_v1, 0.0 }
  0xac   :  { %v216_v60 = vpop.permute.xlu1 %215 }
  0xad   :  { %vm222_vm6 = vcmp.eq.s32.totalorder %v198_v42, %v216_v60 }
  0xae   :  { %177 = vadd.xlane.f32.xlu1 %v176_v56  ;;  %230 = vadd.xlane.f32.xlu0 %v229_v57  ;;  %v228_v0 = vsel %vm222_vm6, %v437_v9, 0.0 }
  0xaf   :  { %v244_v5 = vsel %vm124_vm0, %v228_v0, 0.0 }
  0xb2   :  { %233 = vadd.xlane.f32.xlu1 %v232_v61  ;;  %236 = vadd.xlane.f32.xlu0 %v235_v62  ;;  %v123_v61 = vld [vmem:[%s584_s2 + $0x28] sm:$0xff] }
  0xb6   :  { %239 = vadd.xlane.f32.xlu1 %v238_v3  ;;  %242 = vadd.xlane.f32.xlu0 %v241_v4 }
  0xba   :  { %245 = vadd.xlane.f32.xlu1 %v244_v5 }
 0x12f   :  { %v163_v6 = vpop.xlane.xlu1 %162 }
 0x130   :  { %347 = vlog2.f32 %v163_v6 }
 0x133   :  { %v169_v7 = vpop.xlane.xlu1 %168  ;;  %v166_v8 = vpop.xlane.xlu0 %165 }
 0x134   :  { %349 = vlog2.f32 %v169_v7 }
 0x135   :  { %351 = vlog2.f32 %v166_v8 }
 0x137   :  { %v172_v2 = vpop.xlane.xlu1 %171  ;;  %v175_v10 = vpop.xlane.xlu0 %174 }
 0x138   :  { %353 = vlog2.f32 %v172_v2 }
 0x139   :  { %355 = vlog2.f32 %v175_v10 }
 0x13a   :  { %v348_v11 = vpop.eup %347 }
 0x13b   :  { %v180_v12 = vmul.f32 0.6931472, %v348_v11  ;;  %v178_v21 = vpop.xlane.xlu1 %177  ;;  %v231_v22 = vpop.xlane.xlu0 %230 }
 0x13c   :  { %357 = vlog2.f32 %v178_v21 }
 0x13d   :  { %v191_v9 = vadd.f32 %v180_v12, %v486_v20  ;;  %v120_v20 = vld [vmem:[%s584_s2 + $0x10] sm:$0xff]  ;;  %s385_s2 = smov [#allocation2]  }
 0x13e   :  { %v350_v23 = vpop.eup %349  ;;  %s302_s19 = sshll.u32 %s385_s2, 4  ;;  %s303_s19 = int_to_ptr.vmem [resolvable:$true] %s302_s19 }
 0x13f   :  { %v352_v24 = vpop.eup %351  ;;  %v184_v27 = vmul.f32 0.6931472, %v350_v23  ;;  %v253_v29 = vsub.f32 %v191_v9, %v231_v22  ;;  %v234_v30 = vpop.xlane.xlu1 %233  ;;  %v271_v9 = vld [vmem:[#allocation2] sm:$0x1]  ;;  %s359_s21 = scalar_lea.vmem %s303_s19, 16  ;;  %s363_s22 = scalar_lea.vmem %s303_s19, 32 }
 0x140   :  { %v182_v33 = vmul.f32 0.6931472, %v352_v24  ;;  %v237_v35 = vpop.xlane.xlu0 %236  ;;  %p360_p0 = scmp.ne.s32.totalorder %s303_s19, %s359_s21  ;;  %p364_p1 = scmp.lt.s32.totalorder %s303_s19, %s303_s19 }
 0x141   :  { %v193_v34 = vadd.f32 %v184_v27, %v484_v19  ;;  %v259_v37 = vmul.f32 %v253_v29, %v118_v28  ;;  %p365_p2 = scmp.lt.s32.totalorder %s363_s22, %s359_s21 }
 0x142   :  { %v354_v36 = vpop.eup %353  ;;  %v192_v38 = vadd.f32 %v182_v33, %v494_v26 }
 0x143   :  { %v356_v39 = vpop.eup %355  ;;  %v186_v40 = vmul.f32 0.6931472, %v354_v36  ;;  %v255_v42 = vsub.f32 %v193_v34, %v237_v35  ;;  %v240_v44 = vpop.xlane.xlu1 %239  ;;  %v265_v47 = vsel %vm247_vm7, %v259_v37, 0.0  ;;  %p366_p3 = por %p365_p2, %p364_p1 }
 0x144   :  { %v188_v43 = vmul.f32 0.6931472, %v356_v39  ;;  %v254_v19 = vsub.f32 %v192_v38, %v234_v30  ;;  %v243_v53 = vpop.xlane.xlu0 %242 }
 0x145   :  { %v261_v26 = vmul.f32 %v255_v42, %v120_v20  ;;  %v194_v45 = vadd.f32 %v186_v40, %v492_v25  ;;  %p367_p4 = pnand %p366_p3, %p360_p0 }
 0x146   :  { %v358_v46 = vpop.eup %357  ;;  %v260_v15 = vmul.f32 %v254_v19, %v119_v41  ;;  %v195_v49 = vadd.f32 %v188_v43, %v502_v32  ;;  %v273_v32 = vsel %vm272_vm10, %v265_v47, 0.0 }
 0x147   :  { %v190_v50 = vmul.f32 0.6931472, %v358_v46  ;;  %v256_v51 = vsub.f32 %v194_v45, %v240_v44  ;;  %v267_v54 = vsel %vm249_vm9, %v261_v26, 0.0  ;;  %v246_v62 = vpop.xlane.xlu1 %245 }
 0x148   :  { %v266_v25 = vsel %vm248_vm8, %v260_v15, 0.0  ;;  %v257_v55 = vsub.f32 %v195_v49, %v243_v53  ;;  %v276_v13 = vsel %vm272_vm10, %v267_v54, 0.0 }
 0x149   :  { %v274_v56 = vsel %vm272_vm10, %v266_v25, 0.0  ;;  %v262_v57 = vmul.f32 %v256_v51, %v121_v48  ;;  %v196_v58 = vadd.f32 %v190_v50, %v500_v31 }
 0x14a   :  { %v275_v59 = vadd.f32 %v274_v56, %v273_v32  ;;  %v263_v60 = vmul.f32 %v257_v55, %v122_v52 }
 0x14b   :  { %v268_v14 = vsel %vm250_vm11, %v262_v57, 0.0  ;;  %v258_v63 = vsub.f32 %v196_v58, %v246_v62 }
 0x14c   :  { %v277_v1 = vadd.f32 %v276_v13, %v275_v59  ;;  %v278_v3 = vsel %vm272_vm10, %v268_v14, 0.0  ;;  %v269_v31 = vsel %vm251_vm12, %v263_v60, 0.0 }
 0x14d   :  { %v264_v4 = vmul.f32 %v258_v63, %v123_v61  ;;  %v280_v6 = vsel %vm272_vm10, %v269_v31, 0.0 }
 0x14e   :  { %v279_v0 = vadd.f32 %v278_v3, %v277_v1 }
 0x14f   :  { %v270_v5 = vsel %vm252_vm13, %v264_v4, 0.0 }
 0x150   :  { %v281_v7 = vadd.f32 %v280_v6, %v279_v0  ;;  %v282_v8 = vsel %vm272_vm10, %v270_v5, 0.0 }
 0x152   :  { %v283_v2 = vadd.f32 %v282_v8, %v281_v7 }
 0x154   :  { %284 = vadd.xlane.f32.xlu0 %v283_v2 }
 0x1e1   :  { %v285_v10 = vpop.xlane.xlu0 %284 }
 0x1e2   :  { %v286_v18 = vrot.slane %v285_v10, 4 }
 0x1e4   :  { %v287_v11 = vadd.f32 %v286_v18, %v285_v10 }
 0x1e6   :  { %v288_v12 = vrot.slane %v287_v11, 2 }
 0x1e8   :  { %v289_v21 = vadd.f32 %v288_v12, %v287_v11 }
 0x1ea   :  { %v290_v22 = vrot.slane %v289_v21, 1 }
 0x1ec   :  { %v291_v17 = vadd.f32 %v290_v22, %v289_v21 }
 0x1ee   :  { %328 = vpush %v291_v17 }
 0x21f   :  { %s329_s20 = spop %328 }
 0x220   :  { %v293_v23 = vstv %s329_s20 }
 0x221   :  { %v294_v24 = vadd.f32 %v293_v23, %v271_v9 }
 0x223   :  { %295 = vst [vmem:[#allocation2] sm:$0x1] %v294_v24 }
 0x224   :  { %370 = shalt.err (!%p367_p4)
}
 0x225   :  { %s371_s25 = scalar_lea.hbm %s585_s3, 16 }
 0x226   :  { %p372_p5 = scmp.ne.s32.totalorder %s585_s3, %s371_s25  ;;  %p375_p6 = scmp.lt.u32.totalorder %s371_s25, %s585_s3 }
 0x228   :  { %p377_p7 = pnand %p375_p6, %p372_p5 }
 0x22a   :  { %380 = shalt.err (!%p377_p7)
}
 0x22b   :  { %305 = dma.vmem_to_hbm [thread:$0]  %s303_s19, 16, %s585_s3, [#allocation3]  }
 0x22c   :  { %381 = dma.done.wait [#allocation3], 16  }
 0x22d   :  { %382 = vsyncadd [#allocation3], 4294967280 }
 0x22e   :  { %309 = vsyncpa [#allocation3], 1 }

</bundles_post_ra>
